<compile_context>
chip_gen: v6e
topology: v6e:2x2x1
jax: 0.10.0
libtpu: 0.0.40
codegen_flags: <defaults>
</compile_context>

<pallas_src>
import jax
import jax.numpy as jnp
from jax.experimental import pallas as pl
from jax.experimental.pallas import tpu as pltpu


def _round_up(x, m):
    return pl.cdiv(x, m) * m


def mil_pooling_kernel(a_ref, v_ref, w_ref, b_ref,
                       a_prob_ref, v_prob_ref, frame_ref):
    # a_ref, v_ref : (bt, T, D)    audio / visual features
    # w_ref        : (D, 2*Cp)     cols [0:Cp] = fc_prob, [Cp:2Cp] = fc_frame_att
    # b_ref        : (1, 2*Cp)
    # a_prob_ref   : (1, bt, C)
    # v_prob_ref   : (1, bt, C)
    # frame_ref    : (bt, T, 2*C)  lanes [0:C] = audio, [C:2C] = visual
    bt, t, d = a_ref.shape
    cp = w_ref.shape[1] // 2          # lane-padded class count (multiple of 128)
    c = a_prob_ref.shape[-1]          # true class count

    w = w_ref[...]
    b = b_ref[...]

    def stream(x_ref):
        # One MXU matmul covers both linear heads of this stream.
        # (reshape is relayout-free when T % 8 == 0; correct regardless)
        x = x_ref[...].reshape(bt * t, d)
        logits = jnp.dot(x, w, preferred_element_type=jnp.float32) + b
        logits = logits.reshape(bt, t, 2 * cp)
        lp = logits[:, :, :cp]        # fc_prob logits      (vreg-aligned slice)
        la = logits[:, :, cp:]        # fc_frame_att logits (vreg-aligned slice)
        fp = jax.nn.sigmoid(lp)                               # (bt, t, cp)
        # softmax over time folded into the reduction; attention never stored.
        m = jnp.max(la, axis=1, keepdims=True)
        e = jnp.exp(la - m)                                   # (bt, t, cp)
        denom = jnp.sum(e, axis=1)                            # (bt, cp)
        num = jnp.sum(e * fp, axis=1)                         # (bt, cp)
        prob = num / denom            # exact divide: denom tiny, EUP has slack
        return fp[:, :, :c], prob[:, :c]

    fp_a, p_a = stream(a_ref)
    fp_v, p_v = stream(v_ref)

    # Single lane-packed frame_prob store (unpadded C -> minimal HBM bytes);
    # the wrapper's [B,T,2C] -> [B,T,2,C] reshape is a free minor-dim split.
    frame_ref[...] = jnp.concatenate([fp_a, fp_v], axis=-1)
    a_prob_ref[0] = p_a
    v_prob_ref[0] = p_v


def _choose_batch_block(B, T, D, C, batch_block):
    if batch_block is not None:
        bt = max(1, min(B, int(batch_block)))
    else:
        # DMA-sized tile: ~4 MiB of HBM traffic (a+v inputs, frame_prob out)
        # per grid step, amortizing the ~0.35us/step grid overhead.
        per_b_hbm = 4 * T * (2 * D + 2 * C)
        bt = max(1, min(B, (4 << 20) // max(1, per_b_hbm)))
        # Explicit VMEM budget: double-buffered in/out tiles + in-kernel
        # temporaries (lane-padded), kept well under v7x's 64 MiB physical
        # VMEM (v5e/v6e have 128 MiB).
        Dp = _round_up(D, 128)
        c2p = _round_up(2 * C, 128)
        Cp = _round_up(C, 128)
        per_b_vmem = 4 * T * (2 * (2 * Dp + c2p) + 2 * (2 * Cp + Cp))
        bt = min(bt, max(1, (40 << 20) // max(1, per_b_vmem)))
        # v7x megacore: prefer >= 2 grid steps when each step stays DMA-sized.
        if bt >= B and B > 1 and (B // 2) * per_b_hbm >= (512 << 10):
            bt = B // 2
    # Avoid batch padding / ragged edge blocks: make bt a divisor of B.
    while B % bt:
        bt -= 1
    return bt


def mil_pooling(a, v, w_prob, b_prob, w_att, b_att,
                *, batch_block=None, mxu_dtype=None):
    """a, v: [B, T, D]; w_*: [D, C]; b_*: [C]. Returns (a_prob, v_prob, frame_prob).

    mxu_dtype=jnp.bfloat16 is recommended on v6e/v7x (halves input DMA bytes,
    bf16-native MXU; all post-matmul math stays f32).  Default f32 keeps the
    strict numerical check below valid.
    """
    B, T, D = a.shape
    C = w_prob.shape[1]
    Cp = _round_up(C, 128)
    bt = _choose_batch_block(B, T, D, C, batch_block)
    G = B // bt

    # Fuse the two tiny weight matrices; lane-pad each head to Cp so the
    # in-kernel prob/att split is vreg-aligned.  Weights/bias are negligible.
    wc = jnp.concatenate([jnp.pad(w_prob, ((0, 0), (0, Cp - C))),
                          jnp.pad(w_att, ((0, 0), (0, Cp - C)))], axis=1)   # (D, 2Cp)
    bc = jnp.concatenate([jnp.pad(b_prob, ((0, Cp - C),)),
                          jnp.pad(b_att, ((0, Cp - C),))]).reshape(1, 2 * Cp)

    if mxu_dtype is not None:
        a = a.astype(mxu_dtype)
        v = v.astype(mxu_dtype)
        wc = wc.astype(mxu_dtype)

    out_shapes = (
        jax.ShapeDtypeStruct((G, bt, C), jnp.float32),      # a_prob blocks
        jax.ShapeDtypeStruct((G, bt, C), jnp.float32),      # v_prob blocks
        jax.ShapeDtypeStruct((B, T, 2 * C), jnp.float32),   # frame_prob, lane-packed
    )

    grid_spec = pltpu.PrefetchScalarGridSpec(
        num_scalar_prefetch=0,
        grid=(G,),
        in_specs=[
            pl.BlockSpec((bt, T, D), lambda g: (g, 0, 0)),    # a (no wrapper concat)
            pl.BlockSpec((bt, T, D), lambda g: (g, 0, 0)),    # v
            pl.BlockSpec((D, 2 * Cp), lambda g: (0, 0)),      # fused weights (resident)
            pl.BlockSpec((1, 2 * Cp), lambda g: (0, 0)),      # fused bias
        ],
        out_specs=[
            pl.BlockSpec((1, bt, C), lambda g: (g, 0, 0)),    # a_prob
            pl.BlockSpec((1, bt, C), lambda g: (g, 0, 0)),    # v_prob
            pl.BlockSpec((bt, T, 2 * C), lambda g: (g, 0, 0)),  # frame_prob
        ],
    )

    a_blk, v_blk, frame = pl.pallas_call(
        mil_pooling_kernel,
        out_shape=out_shapes,
        grid_spec=grid_spec,
        compiler_params=pltpu.CompilerParams(
            dimension_semantics=("parallel",),
            vmem_limit_bytes=48 * 1024 * 1024),
    )(a, v, wc, bc)

    # Free metadata-level reshapes (no extra HBM round trips).
    a_prob = a_blk.reshape(B, C)
    v_prob = v_blk.reshape(B, C)
    frame_prob = frame.reshape(B, T, 2, C)   # minor-dim split: bitcast reshape
    return a_prob, v_prob, frame_prob


def mil_pooling_ref(a, v, w_prob, b_prob, w_att, b_att):
    """Pure-JAX reference reproducing the torch forward exactly."""
    x = jnp.concatenate([a[:, :, None, :], v[:, :, None, :]], axis=-2)  # [B,T,2,D]
    frame_prob = jax.nn.sigmoid(x @ w_prob + b_prob)                    # [B,T,2,C]
    frame_att = jax.nn.softmax(x @ w_att + b_att, axis=1)               # [B,T,2,C]
    temporal_prob = frame_att * frame_prob
    a_prob = temporal_prob[:, :, 0, :].sum(axis=1)
    v_prob = temporal_prob[:, :, 1, :].sum(axis=1)
    return a_prob, v_prob, frame_prob


if __name__ == "__main__":
    B, T, D, C = 2, 8, 32, 35  # small model_dim=32, num_cls=35 (module default)

    key = jax.random.PRNGKey(0)
    ka, kv, kwp, kbp, kwa, kba = jax.random.split(key, 6)

    a = jax.random.normal(ka, (B, T, D), dtype=jnp.float32)
    v = jax.random.normal(kv, (B, T, D), dtype=jnp.float32)

    # Deterministic nn.Linear-style init: U(-1/sqrt(D), 1/sqrt(D)).
    bound = 1.0 / jnp.sqrt(jnp.float32(D))
    w_prob = jax.random.uniform(kwp, (D, C), jnp.float32, -bound, bound)
    b_prob = jax.random.uniform(kbp, (C,), jnp.float32, -bound, bound)
    w_att = jax.random.uniform(kwa, (D, C), jnp.float32, -bound, bound)
    b_att = jax.random.uniform(kba, (C,), jnp.float32, -bound, bound)

    a_prob, v_prob, frame_prob = mil_pooling(a, v, w_prob, b_prob, w_att, b_att)
    jax.block_until_ready((a_prob, v_prob, frame_prob))

    # Correctness check against pure-JAX reference (exact divide now used in
    # the softmax fold, so tolerances are tight f32-accumulation-order level).
    a_ref, v_ref_, fp_ref = mil_pooling_ref(a, v, w_prob, b_prob, w_att, b_att)
    assert frame_prob.shape == (B, T, 2, C)
    assert jnp.allclose(frame_prob, fp_ref, atol=1e-5), "frame_prob mismatch"
    assert jnp.allclose(a_prob, a_ref, atol=2e-5), "a_prob mismatch"
    assert jnp.allclose(v_prob, v_ref_, atol=2e-5), "v_prob mismatch"

    print("KERNEL_OK")
</pallas_src>

<mosaic_0001>
module attributes {stable_mosaic.version = 11 : i64} {
  func.func @mil_pooling_kernel(%arg0: i32, %arg1: memref<2x8x32xf32, #tpu.memory_space<vmem>>, %arg2: memref<2x8x32xf32, #tpu.memory_space<vmem>>, %arg3: memref<32x256xf32, #tpu.memory_space<vmem>>, %arg4: memref<1x256xf32, #tpu.memory_space<vmem>>, %arg5: memref<1x2x35xf32, #tpu.memory_space<vmem>>, %arg6: memref<1x2x35xf32, #tpu.memory_space<vmem>>, %arg7: memref<2x8x70xf32, #tpu.memory_space<vmem>>) attributes {dimension_semantics = [#tpu.dimension_semantics<parallel>], iteration_bounds = array<i64: 1>, scalar_prefetch = 0 : i64, scratch_operands = 0 : i64, tpu.core_type = #tpu.core_type<tc>, window_params = [{transform_indices = @transform_0, window_bounds = array<i64: 2, 8, 32>}, {transform_indices = @transform_1, window_bounds = array<i64: 2, 8, 32>}, {pipeline_mode = #tpu.pipeline_mode<synchronous>, transform_indices = @transform_2, window_bounds = array<i64: 32, 256>}, {pipeline_mode = #tpu.pipeline_mode<synchronous>, transform_indices = @transform_3, window_bounds = array<i64: 1, 256>}, {transform_indices = @transform_4, window_bounds = array<i64: 1, 2, 35>}, {transform_indices = @transform_5, window_bounds = array<i64: 1, 2, 35>}, {transform_indices = @transform_6, window_bounds = array<i64: 2, 8, 70>}]} {
    %c0 = arith.constant 0 : index
    %c0_0 = arith.constant 0 : index
    %0 = vector.load %arg3[%c0, %c0_0] : memref<32x256xf32, #tpu.memory_space<vmem>>, vector<32x256xf32>
    %c0_1 = arith.constant 0 : index
    %c0_2 = arith.constant 0 : index
    %1 = vector.load %arg4[%c0_1, %c0_2] : memref<1x256xf32, #tpu.memory_space<vmem>>, vector<1x256xf32>
    %c0_3 = arith.constant 0 : index
    %c0_4 = arith.constant 0 : index
    %c0_5 = arith.constant 0 : index
    %2 = vector.load %arg1[%c0_3, %c0_4, %c0_5] : memref<2x8x32xf32, #tpu.memory_space<vmem>>, vector<2x8x32xf32>
    %3 = vector.shape_cast %2 : vector<2x8x32xf32> to vector<16x32xf32>
    %cst = arith.constant dense<0.000000e+00> : vector<16x256xf32>
    %4 = tpu.matmul %3, %0, %cst {dimension_numbers = #tpu.dot_dimension_numbers<[1], [0], [0], [1], [0, 0, 1, 1], [], []>} : vector<16x32xf32>, vector<32x256xf32>, vector<16x256xf32> -> vector<16x256xf32>
    %5 = vector.broadcast %1 : vector<1x256xf32> to vector<16x256xf32>
    %6 = arith.addf %4, %5 : vector<16x256xf32>
    %7 = vector.shape_cast %6 : vector<16x256xf32> to vector<2x8x256xf32>
    %8 = vector.extract_strided_slice %7 {offsets = [0, 0, 0], sizes = [2, 8, 128], strides = [1, 1, 1]} : vector<2x8x256xf32> to vector<2x8x128xf32>
    %9 = vector.extract_strided_slice %7 {offsets = [0, 0, 128], sizes = [2, 8, 128], strides = [1, 1, 1]} : vector<2x8x256xf32> to vector<2x8x128xf32>
    %10 = arith.negf %8 : vector<2x8x128xf32>
    %11 = math.exp %10 : vector<2x8x128xf32>
    %cst_6 = arith.constant 1.000000e+00 : f32
    %12 = vector.broadcast %cst_6 : f32 to vector<2x8x128xf32>
    %13 = arith.addf %12, %11 : vector<2x8x128xf32>
    %14 = arith.divf %12, %13 : vector<2x8x128xf32>
    %cst_7 = arith.constant dense<0xFF800000> : vector<2x128xf32>
    %15 = vector.multi_reduction <maximumf>, %9, %cst_7 [1] : vector<2x8x128xf32> to vector<2x128xf32>
    %16 = vector.shape_cast %15 : vector<2x128xf32> to vector<2x1x128xf32>
    %17 = vector.broadcast %16 : vector<2x1x128xf32> to vector<2x8x128xf32>
    %18 = arith.subf %9, %17 : vector<2x8x128xf32>
    %19 = math.exp %18 : vector<2x8x128xf32>
    %cst_8 = arith.constant dense<0.000000e+00> : vector<2x128xf32>
    %20 = vector.multi_reduction <add>, %19, %cst_8 [1] : vector<2x8x128xf32> to vector<2x128xf32>
    %21 = arith.mulf %19, %14 : vector<2x8x128xf32>
    %cst_9 = arith.constant dense<0.000000e+00> : vector<2x128xf32>
    %22 = vector.multi_reduction <add>, %21, %cst_9 [1] : vector<2x8x128xf32> to vector<2x128xf32>
    %23 = arith.divf %22, %20 : vector<2x128xf32>
    %24 = vector.extract_strided_slice %14 {offsets = [0, 0, 0], sizes = [2, 8, 35], strides = [1, 1, 1]} : vector<2x8x128xf32> to vector<2x8x35xf32>
    %25 = vector.extract_strided_slice %23 {offsets = [0, 0], sizes = [2, 35], strides = [1, 1]} : vector<2x128xf32> to vector<2x35xf32>
    %c0_10 = arith.constant 0 : index
    %c0_11 = arith.constant 0 : index
    %c0_12 = arith.constant 0 : index
    %26 = vector.load %arg2[%c0_10, %c0_11, %c0_12] : memref<2x8x32xf32, #tpu.memory_space<vmem>>, vector<2x8x32xf32>
    %27 = vector.shape_cast %26 : vector<2x8x32xf32> to vector<16x32xf32>
    %cst_13 = arith.constant dense<0.000000e+00> : vector<16x256xf32>
    %28 = tpu.matmul %27, %0, %cst_13 {dimension_numbers = #tpu.dot_dimension_numbers<[1], [0], [0], [1], [0, 0, 1, 1], [], []>} : vector<16x32xf32>, vector<32x256xf32>, vector<16x256xf32> -> vector<16x256xf32>
    %29 = vector.broadcast %1 : vector<1x256xf32> to vector<16x256xf32>
    %30 = arith.addf %28, %29 : vector<16x256xf32>
    %31 = vector.shape_cast %30 : vector<16x256xf32> to vector<2x8x256xf32>
    %32 = vector.extract_strided_slice %31 {offsets = [0, 0, 0], sizes = [2, 8, 128], strides = [1, 1, 1]} : vector<2x8x256xf32> to vector<2x8x128xf32>
    %33 = vector.extract_strided_slice %31 {offsets = [0, 0, 128], sizes = [2, 8, 128], strides = [1, 1, 1]} : vector<2x8x256xf32> to vector<2x8x128xf32>
    %34 = arith.negf %32 : vector<2x8x128xf32>
    %35 = math.exp %34 : vector<2x8x128xf32>
    %cst_14 = arith.constant 1.000000e+00 : f32
    %36 = vector.broadcast %cst_14 : f32 to vector<2x8x128xf32>
    %37 = arith.addf %36, %35 : vector<2x8x128xf32>
    %38 = arith.divf %36, %37 : vector<2x8x128xf32>
    %cst_15 = arith.constant dense<0xFF800000> : vector<2x128xf32>
    %39 = vector.multi_reduction <maximumf>, %33, %cst_15 [1] : vector<2x8x128xf32> to vector<2x128xf32>
    %40 = vector.shape_cast %39 : vector<2x128xf32> to vector<2x1x128xf32>
    %41 = vector.broadcast %40 : vector<2x1x128xf32> to vector<2x8x128xf32>
    %42 = arith.subf %33, %41 : vector<2x8x128xf32>
    %43 = math.exp %42 : vector<2x8x128xf32>
    %cst_16 = arith.constant dense<0.000000e+00> : vector<2x128xf32>
    %44 = vector.multi_reduction <add>, %43, %cst_16 [1] : vector<2x8x128xf32> to vector<2x128xf32>
    %45 = arith.mulf %43, %38 : vector<2x8x128xf32>
    %cst_17 = arith.constant dense<0.000000e+00> : vector<2x128xf32>
    %46 = vector.multi_reduction <add>, %45, %cst_17 [1] : vector<2x8x128xf32> to vector<2x128xf32>
    %47 = arith.divf %46, %44 : vector<2x128xf32>
    %48 = vector.extract_strided_slice %38 {offsets = [0, 0, 0], sizes = [2, 8, 35], strides = [1, 1, 1]} : vector<2x8x128xf32> to vector<2x8x35xf32>
    %49 = vector.extract_strided_slice %47 {offsets = [0, 0], sizes = [2, 35], strides = [1, 1]} : vector<2x128xf32> to vector<2x35xf32>
    %50 = tpu.concatenate %24, %48 in 2 : vector<2x8x35xf32>, vector<2x8x35xf32> -> vector<2x8x70xf32>
    %c0_18 = arith.constant 0 : index
    %c0_19 = arith.constant 0 : index
    %c0_20 = arith.constant 0 : index
    %51 = vector.load %arg7[%c0_18, %c0_19, %c0_20] : memref<2x8x70xf32, #tpu.memory_space<vmem>>, vector<2x8x70xf32>
    tpu.vector_store %arg7[%c0_18, %c0_19, %c0_20], %50 {strides = array<i32>} : memref<2x8x70xf32, #tpu.memory_space<vmem>>, vector<2x8x70xf32>,
    %c0_21 = arith.constant 0 : index
    %c0_22 = arith.constant 0 : index
    %c0_23 = arith.constant 0 : index
    %52 = vector.load %arg5[%c0_21, %c0_22, %c0_23] : memref<1x2x35xf32, #tpu.memory_space<vmem>>, vector<1x2x35xf32>
    %53 = vector.shape_cast %52 : vector<1x2x35xf32> to vector<2x35xf32>
    %54 = vector.shape_cast %25 : vector<2x35xf32> to vector<1x2x35xf32>
    tpu.vector_store %arg5[%c0_21, %c0_22, %c0_23], %54 {strides = array<i32>} : memref<1x2x35xf32, #tpu.memory_space<vmem>>, vector<1x2x35xf32>,
    %c0_24 = arith.constant 0 : index
    %c0_25 = arith.constant 0 : index
    %c0_26 = arith.constant 0 : index
    %55 = vector.load %arg6[%c0_24, %c0_25, %c0_26] : memref<1x2x35xf32, #tpu.memory_space<vmem>>, vector<1x2x35xf32>
    %56 = vector.shape_cast %55 : vector<1x2x35xf32> to vector<2x35xf32>
    %57 = vector.shape_cast %49 : vector<2x35xf32> to vector<1x2x35xf32>
    tpu.vector_store %arg6[%c0_24, %c0_25, %c0_26], %57 {strides = array<i32>} : memref<1x2x35xf32, #tpu.memory_space<vmem>>, vector<1x2x35xf32>,
    return
  }
  func.func @transform_0(%arg0: i32) -> (i32, i32, i32) {
    %c0_i32 = arith.constant 0 : i32
    %c0_i32_0 = arith.constant 0 : i32
    %c0_i32_1 = arith.constant 0 : i32
    return %arg0, %c0_i32, %c0_i32_0 : i32, i32, i32
  }
  func.func @transform_1(%arg0: i32) -> (i32, i32, i32) {
    %c0_i32 = arith.constant 0 : i32
    %c0_i32_0 = arith.constant 0 : i32
    %c0_i32_1 = arith.constant 0 : i32
    return %arg0, %c0_i32, %c0_i32_0 : i32, i32, i32
  }
  func.func @transform_2(%arg0: i32) -> (i32, i32) {
    %c0_i32 = arith.constant 0 : i32
    %c0_i32_0 = arith.constant 0 : i32
    %c0_i32_1 = arith.constant 0 : i32
    return %c0_i32, %c0_i32_0 : i32, i32
  }
  func.func @transform_3(%arg0: i32) -> (i32, i32) {
    %c0_i32 = arith.constant 0 : i32
    %c0_i32_0 = arith.constant 0 : i32
    %c0_i32_1 = arith.constant 0 : i32
    return %c0_i32, %c0_i32_0 : i32, i32
  }
  func.func @transform_4(%arg0: i32) -> (i32, i32, i32) {
    %c0_i32 = arith.constant 0 : i32
    %c0_i32_0 = arith.constant 0 : i32
    %c0_i32_1 = arith.constant 0 : i32
    return %arg0, %c0_i32, %c0_i32_0 : i32, i32, i32
  }
  func.func @transform_5(%arg0: i32) -> (i32, i32, i32) {
    %c0_i32 = arith.constant 0 : i32
    %c0_i32_0 = arith.constant 0 : i32
    %c0_i32_1 = arith.constant 0 : i32
    return %arg0, %c0_i32, %c0_i32_0 : i32, i32, i32
  }
  func.func @transform_6(%arg0: i32) -> (i32, i32, i32) {
    %c0_i32 = arith.constant 0 : i32
    %c0_i32_0 = arith.constant 0 : i32
    %c0_i32_1 = arith.constant 0 : i32
    return %arg0, %c0_i32, %c0_i32_0 : i32, i32, i32
  }
}

</mosaic_0001>

<bundles_post_ra>
// kernel: tpu_custom_call.1
= control target key start
LH: loop header
LB: loop body
LE: loop exit
PB: predicated region body
PF: predicated region fallthrough
CT: control target
= control target key end

     0   :  { %12 = vsyncpa [#allocation3], 0  ;;  %s714_s0 = inlined_call_operand.hbm [shape: f32[2,8,32], index: 0, kind: input, shape index: {}]   ;;  %s715_s1 = inlined_call_operand.hbm [shape: f32[2,8,32], index: 1, kind: input, shape index: {}]   ;;  %s716_s2 = inlined_call_operand.hbm [shape: f32[32,256], index: 2, kind: input, shape index: {}]   ;;  %s717_s3 = inlined_call_operand.vmem [shape: f32[1,256], index: 3, kind: input, shape index: {}]   ;;  %s718_s4 = inlined_call_operand.hbm [shape: f32[1,2,35], index: 4, kind: output, shape index: {0}]   ;;  %s719_s5 = inlined_call_operand.hbm [shape: f32[1,2,35], index: 5, kind: output, shape index: {1}]   ;;  %s720_s6 = inlined_call_operand.hbm [shape: f32[2,8,70], index: 6, kind: output, shape index: {2}]  }
   0x1   :  { %13 = vsyncpa [#allocation6], 0 }
   0x2   :  { %14 = vsyncpa [#allocation4], 0 }
   0x3   :  { %15 = vsyncpa [#allocation10], 0  ;;  %s625_s21 = smov [#allocation5]   ;;  %s626_s23 = smov [#allocation2]  }
   0x4   :  { %s33_s22 = sshll.u32 %s625_s21, 4  ;;  %s21_s24 = sshll.u32 %s626_s23, 4  ;;  %s34_s22 = int_to_ptr.vmem [resolvable:$true] %s33_s22  ;;  %s22_s24 = int_to_ptr.vmem [resolvable:$true] %s21_s24 }
   0x5   :  { %s505_s25 = scalar_lea.vmem %s34_s22, 256  ;;  %p510_p1 = scmp.lt.s32.totalorder %s34_s22, %s34_s22 }
   0x6   :  { %p506_p0 = scmp.ne.s32.totalorder %s34_s22, %s505_s25  ;;  %p511_p2 = scmp.lt.s32.totalorder %s505_s25, %s505_s25 }
   0x8   :  { %p512_p3 = por %p511_p2, %p510_p1 }
   0xa   :  { %p513_p4 = pnand %p512_p3, %p506_p0 }
   0xc   :  { %516 = shalt.err (!%p513_p4)
}
   0xd   :  { %s627_s26 = smov 128   ;;  %s628_s27 = smov 8  }
   0xe   :  { %39 = dma.hbm_to_vmem [thread:$0]  %s715_s1, 256, %s34_s22, [#allocation6], %s627_s26, %s627_s26, %s628_s27  }
   0xf   :  { %s525_s30 = scalar_lea.vmem %s22_s24, 256  ;;  %p530_p6 = scmp.lt.s32.totalorder %s22_s24, %s22_s24 }
  0x10   :  { %p526_p5 = scmp.ne.s32.totalorder %s22_s24, %s525_s30  ;;  %p531_p7 = scmp.lt.s32.totalorder %s525_s30, %s525_s30 }
  0x12   :  { %p532_p8 = por %p531_p7, %p530_p6 }
  0x14   :  { %p533_p9 = pnand %p532_p8, %p526_p5 }
  0x16   :  { %536 = shalt.err (!%p533_p9)
}
  0x17   :  { %27 = dma.hbm_to_vmem [thread:$0]  %s714_s0, 256, %s22_s24, [#allocation3], %s627_s26, %s627_s26, %s628_s27  }
  0x18   :  { %s629_s9 = smov [#allocation7]  }
  0x19   :  { %s45_s10 = sshll.u32 %s629_s9, 4  ;;  %s46_s10 = int_to_ptr.vmem [resolvable:$true] %s45_s10 }
  0x1a   :  { %s545_s11 = scalar_lea.vmem %s46_s10, 1024  ;;  %p550_p11 = scmp.lt.s32.totalorder %s46_s10, %s46_s10 }
  0x1b   :  { %p546_p10 = scmp.ne.s32.totalorder %s46_s10, %s545_s11  ;;  %p551_p12 = scmp.lt.s32.totalorder %s545_s11, %s545_s11 }
  0x1d   :  { %p552_p13 = por %p551_p12, %p550_p11 }
  0x1f   :  { %p553_p0 = pnand %p552_p13, %p546_p10 }
  0x21   :  { %556 = shalt.err (!%p553_p0)
}
  0x22   :  { %s630_s1 = smov 256   ;;  %s631_s12 = smov 16  }
  0x23   :  { %51 = dma.hbm_to_vmem [thread:$0]  %s716_s2, 1024, %s46_s10, [#allocation6], %s630_s1, %s630_s1, %s631_s12  }
  0x24   :  { %617 = dma.done.wait [#allocation3], 256  }
  0x25   :  { %618 = vsyncadd [#allocation3], 4294967040 }
  0x26   :  { %619 = dma.done.wait [#allocation6], 1280  }
  0x27   :  { %620 = vsyncadd [#allocation6], 4294966016  ;;  %v632_v0 = vmov 0.0   ;;  %v70_v1 = vld [vmem:[#allocation7 + $0x38] sm:$0xff]  ;;  %v69_v2 = vld [vmem:[#allocation7 + $0x30] sm:$0xff]  ;;  %vm85_vm0 = vcmask 261120   ;;  %v75_v13 = vlaneseq }
  0x28   :  { %301 = vmatprep.mubr.f32.mxu1 %v632_v0  ;;  %156 = vmatprep.mubr.f32.mxu0 %v632_v0  ;;  %v68_v3 = vld [vmem:[#allocation7 + $0x28] sm:$0xff]  ;;  %v67_v4 = vld [vmem:[#allocation7 + $0x20] sm:$0xff]  ;;  %v66_v5 = vld [vmem:[#allocation7 + $0x18] sm:$0xff]  ;;  %s634_s15 = smov [#allocation9]   ;;  %vm390_vm1 = vcmask 1041409   ;;  %vm393_vm2 = vcmask 279552  }
  0x29   :  { %261 = vmatprep.subr.mxu1 %v70_v1  ;;  %116 = vmatprep.subr.mxu0 %v70_v1  ;;  %v65_v6 = vld [vmem:[#allocation7 + $0x10] sm:$0xff]  ;;  %v64_v7 = vld [vmem:[#allocation7 + $0x8] sm:$0xff]  ;;  %v63_v8 = vld [vmem:[#allocation7] sm:$0xff]  ;;  %v76_v14 = vshrl.u32 %v75_v13, 7  ;;  %s416_s16 = sshll.u32 %s634_s15, 4  ;;  %s635_s17 = smov [#allocation8]   ;;  %s417_s16 = int_to_ptr.vmem [resolvable:$true] %s416_s16 }
  0x2a   :  { %262 = vmatpush1.msra.mxu1 %v69_v2  ;;  %117 = vmatpush1.msra.mxu0 %v69_v2  ;;  %v229_v9 = vld [vmem:[#allocation5] sm:$0xff]  ;;  %v72_v10 = vld [vmem:[#allocation2] sm:$0xff]  ;;  %v230_v11 = vld [vmem:[#allocation5 + $0x8] sm:$0xff]  ;;  %s406_s18 = sshll.u32 %s635_s17, 4  ;;  %s557_s19 = scalar_lea.vmem %s417_s16, 32  ;;  %s407_s18 = int_to_ptr.vmem [resolvable:$true] %s406_s18 }
  0x2b   :  { %263 = vmatprep.subr.mxu1 %v68_v3  ;;  %118 = vmatprep.subr.mxu0 %v68_v3  ;;  %v73_v12 = vld [vmem:[#allocation2 + $0x8] sm:$0xff]  ;;  %v77_v15 = vsub.s32 0, %v76_v14  ;;  %v71_v16 = vld [vmem:[%s717_s3] sm:$0x3]  ;;  %v81_v17 = vsub.s32 1, %v76_v14  ;;  %s633_s3 = smov 35   ;;  %p558_p1 = scmp.ne.s32.totalorder %s417_s16, %s557_s19 }
  0x2c   :  { %264 = vmatpush1.msra.mxu1 %v67_v4  ;;  %119 = vmatpush1.msra.mxu0 %v67_v4  ;;  %p562_p2 = scmp.lt.s32.totalorder %s417_s16, %s417_s16  ;;  %p563_p3 = scmp.lt.s32.totalorder %s557_s19, %s557_s19 }
  0x2d   :  { %265 = vmatprep.subr.mxu1 %v66_v5  ;;  %120 = vmatprep.subr.mxu0 %v66_v5  ;;  %v78_v18 = vrot.slane %v71_v16, %v77_v15  ;;  %v82_v19 = vrot.slane %v71_v16, %v81_v17 }
  0x2e   :  { %266 = vmatpush1.msra.mxu1 %v65_v6  ;;  %121 = vmatpush1.msra.mxu0 %v65_v6  ;;  %p564_p4 = por %p563_p3, %p562_p2 }
  0x2f   :  { %267 = vmatprep.subr.mxu1 %v64_v7  ;;  %122 = vmatprep.subr.mxu0 %v64_v7 }
  0x30   :  { %268 = vmatpush1.msra.mxu1 %v63_v8  ;;  %123 = vmatpush1.msra.mxu0 %v63_v8  ;;  %p565_p5 = pnand %p564_p4, %p558_p1 }
  0x31   :  { %449 = vmatmul.mubr.msk.f32.vlgmr.msra.gmra.mxu1 %vm85_vm0, %v229_v9  ;;  %445 = vmatmul.mubr.msk.f32.vlgmr.msra.gmra.mxu0 %vm85_vm0, %v72_v10 }
  0x32   :  { %307 = vmatprep.mubr.f32.mxu1 %v632_v0  ;;  %162 = vmatprep.mubr.f32.mxu0 %v632_v0 }
  0x35   :  { %450 = vmatmul.mubr.msk.f32.gmra.mxu1 %vm85_vm0, %v230_v11  ;;  %446 = vmatmul.mubr.msk.f32.gmra.mxu0 %vm85_vm0, %v73_v12 }
  0xf1   :  { %v303_v20 = vpop.f32.mrf.mxu1  ;;  %v158_v21 = vpop.f32.mrf.mxu0 }
  0xf2   :  { %v304_v22 = vadd.f32 %v303_v20, %v78_v18  ;;  %v159_v23 = vadd.f32 %v158_v21, %v78_v18 }
  0xf3   :  { %v305_v24 = vpop.f32.mrf.mxu1  ;;  %v160_v25 = vpop.f32.mrf.mxu0 }
  0xf4   :  { %v451_v26 = vmul.f32 -1.442695, %v304_v22  ;;  %v306_v27 = vadd.f32 %v305_v24, %v82_v19  ;;  %v447_v28 = vmul.f32 -1.442695, %v159_v23  ;;  %v161_v29 = vadd.f32 %v160_v25, %v82_v19 }
  0xf5   :  { %v309_v30 = vpop.f32.mrf.mxu1  ;;  %v164_v31 = vpop.f32.mrf.mxu0 }
  0xf6   :  { %465 = vpow2.f32 %v451_v26  ;;  %v326_v32 = vrot.slane %v306_v27, 4  ;;  %v310_v33 = vadd.f32 %v309_v30, %v78_v18  ;;  %v181_v34 = vrot.slane %v161_v29, 4 }
  0xf7   :  { %v311_v35 = vpop.f32.mrf.mxu1  ;;  %467 = vpow2.f32 %v447_v28  ;;  %v165_v36 = vadd.f32 %v164_v31, %v78_v18  ;;  %v166_v37 = vpop.f32.mrf.mxu0 }
  0xf8   :  { %v327_v38 = vmax.f32 %v306_v27, %v326_v32  ;;  %v452_v39 = vmul.f32 -1.442695, %v310_v33  ;;  %v312_v40 = vadd.f32 %v311_v35, %v82_v19  ;;  %v182_v41 = vmax.f32 %v161_v29, %v181_v34 }
  0xf9   :  { %v448_v42 = vmul.f32 -1.442695, %v165_v36  ;;  %v167_v43 = vadd.f32 %v166_v37, %v82_v19 }
  0xfa   :  { %v328_v44 = vrot.slane %v327_v38, 2  ;;  %469 = vpow2.f32 %v452_v39  ;;  %v332_v45 = vrot.slane %v312_v40, 4  ;;  %v183_v46 = vrot.slane %v182_v41, 2 }
  0xfb   :  { %471 = vpow2.f32 %v448_v42  ;;  %v187_v47 = vrot.slane %v167_v43, 4 }
  0xfc   :  { %v329_v48 = vmax.f32 %v327_v38, %v328_v44  ;;  %v333_v49 = vmax.f32 %v312_v40, %v332_v45  ;;  %v184_v50 = vmax.f32 %v182_v41, %v183_v46 }
  0xfd   :  { %v188_v51 = vmax.f32 %v167_v43, %v187_v47 }
  0xfe   :  { %v330_v52 = vrot.slane %v329_v48, 1  ;;  %v334_v53 = vrot.slane %v333_v49, 2  ;;  %v185_v54 = vrot.slane %v184_v50, 1 }
  0xff   :  { %v189_v55 = vrot.slane %v188_v51, 2 }
 0x100   :  { %v331_v56 = vmax.f32 %v329_v48, %v330_v52  ;;  %v335_v57 = vmax.f32 %v333_v49, %v334_v53  ;;  %v186_v58 = vmax.f32 %v184_v50, %v185_v54 }
 0x101   :  { %v190_v59 = vmax.f32 %v188_v51, %v189_v55 }
 0x102   :  { %v338_v60 = vsub.f32 %v306_v27, %v331_v56  ;;  %v336_v61 = vrot.slane %v335_v57, 1  ;;  %v193_v62 = vsub.f32 %v161_v29, %v186_v58 }
 0x103   :  { %v466_v63 = vpop.eup %465  ;;  %v191_v0 = vrot.slane %v190_v59, 1 }
 0x104   :  { %v468_v1 = vpop.eup %467  ;;  %v320_v2 = vadd.f32 1.0, %v466_v63  ;;  %v340_v3 = vmul.f32 1.442695, %v338_v60  ;;  %v337_v4 = vmax.f32 %v335_v57, %v336_v61  ;;  %v195_v6 = vmul.f32 1.442695, %v193_v62 }
 0x105   :  { %v175_v5 = vadd.f32 1.0, %v468_v1  ;;  %v192_v7 = vmax.f32 %v190_v59, %v191_v0 }
 0x106   :  { %473 = vrcp.f32 %v320_v2  ;;  %v339_v8 = vsub.f32 %v312_v40, %v337_v4 }
 0x107   :  { %v470_v9 = vpop.eup %469  ;;  %475 = vpow2.f32 %v340_v3  ;;  %v194_v10 = vsub.f32 %v167_v43, %v192_v7 }
 0x108   :  { %v472_v11 = vpop.eup %471  ;;  %v321_v12 = vadd.f32 1.0, %v470_v9  ;;  %v342_v13 = vmul.f32 1.442695, %v339_v8  ;;  %477 = vrcp.f32 %v175_v5 }
 0x109   :  { %479 = vpow2.f32 %v195_v6  ;;  %v176_v14 = vadd.f32 1.0, %v472_v11  ;;  %v197_v15 = vmul.f32 1.442695, %v194_v10 }
 0x10a   :  { %481 = vrcp.f32 %v321_v12 }
 0x10b   :  { %483 = vpow2.f32 %v342_v13 }
 0x10c   :  { %485 = vrcp.f32 %v176_v14 }
 0x10d   :  { %487 = vpow2.f32 %v197_v15 }
 0x113   :  { %v474_v16 = vpop.eup %473 }
 0x114   :  { %v476_v17 = vpop.eup %475  ;;  %376 = vrot.lane.b32.xlu0 %v474_v16, %s633_s3 }
 0x115   :  { %v690_v18 = vpop.eup %477  ;;  %v344_v19 = vrot.slane %v476_v17, 4  ;;  %v356_v29 = vmul.f32 %v476_v17, %v474_v16 }
 0x116   :  { %v480_v20 = vpop.eup %479 }
 0x117   :  { %v482_v21 = vpop.eup %481  ;;  %v345_v22 = vadd.f32 %v476_v17, %v344_v19  ;;  %v199_v23 = vrot.slane %v480_v20, 4  ;;  %v211_v25 = vmul.f32 %v480_v20, %v690_v18  ;;  %v358_v41 = vrot.slane %v356_v29, 4 }
 0x118   :  { %v484_v24 = vpop.eup %483  ;;  %378 = vrot.lane.b32.xlu0 %v482_v21, %s633_s3 }
 0x119   :  { %v693_v26 = vpop.eup %485  ;;  %v346_v27 = vrot.slane %v345_v22, 2  ;;  %v350_v28 = vrot.slane %v484_v24, 4  ;;  %v357_v30 = vmul.f32 %v484_v24, %v482_v21  ;;  %v200_v32 = vadd.f32 %v480_v20, %v199_v23 }
 0x11a   :  { %v488_v31 = vpop.eup %487  ;;  %v213_v38 = vrot.slane %v211_v25, 4  ;;  %v359_v52 = vadd.f32 %v358_v41, %v356_v29 }
 0x11b   :  { %v347_v33 = vadd.f32 %v346_v27, %v345_v22  ;;  %v351_v34 = vadd.f32 %v484_v24, %v350_v28  ;;  %v201_v35 = vrot.slane %v200_v32, 2  ;;  %v205_v36 = vrot.slane %v488_v31, 4 }
 0x11c   :  { %v212_v37 = vmul.f32 %v488_v31, %v693_v26  ;;  %v364_v42 = vrot.slane %v357_v30, 4  ;;  %v214_v50 = vadd.f32 %v213_v38, %v211_v25  ;;  %v360_v60 = vrot.slane %v359_v52, 2 }
 0x11d   :  { %v348_v39 = vrot.slane %v347_v33, 1  ;;  %v352_v40 = vrot.slane %v351_v34, 2  ;;  %v202_v43 = vadd.f32 %v201_v35, %v200_v32  ;;  %v206_v44 = vadd.f32 %v488_v31, %v205_v36 }
 0x11e   :  { %v219_v45 = vrot.slane %v212_v37, 4  ;;  %v365_v53 = vadd.f32 %v364_v42, %v357_v30  ;;  %v215_v59 = vrot.slane %v214_v50, 2  ;;  %v361_v1 = vadd.f32 %v360_v60, %v359_v52 }
 0x11f   :  { %v349_v46 = vadd.f32 %v348_v39, %v347_v33  ;;  %v353_v47 = vadd.f32 %v352_v40, %v351_v34  ;;  %v203_v48 = vrot.slane %v202_v43, 1  ;;  %v207_v49 = vrot.slane %v206_v44, 2 }
 0x120   :  { %v220_v56 = vadd.f32 %v219_v45, %v212_v37  ;;  %v366_v61 = vrot.slane %v365_v53, 2  ;;  %v216_v0 = vadd.f32 %v215_v59, %v214_v50  ;;  %v362_v5 = vrot.slane %v361_v1, 1 }
 0x121   :  { %v354_v51 = vrot.slane %v353_v47, 1  ;;  %v204_v54 = vadd.f32 %v203_v48, %v202_v43  ;;  %v208_v55 = vadd.f32 %v207_v49, %v206_v44  ;;  %489 = vrcp.f32 %v349_v46 }
 0x122   :  { %v221_v63 = vrot.slane %v220_v56, 2  ;;  %v367_v2 = vadd.f32 %v366_v61, %v365_v53  ;;  %v217_v4 = vrot.slane %v216_v0, 1  ;;  %v363_v11 = vadd.f32 %v362_v5, %v361_v1 }
 0x123   :  { %v355_v57 = vadd.f32 %v354_v51, %v353_v47  ;;  %v209_v58 = vrot.slane %v208_v55, 1  ;;  %491 = vrcp.f32 %v204_v54 }
 0x124   :  { %v222_v3 = vadd.f32 %v221_v63, %v220_v56  ;;  %v368_v6 = vrot.slane %v367_v2, 1  ;;  %v218_v9 = vadd.f32 %v217_v4, %v216_v0 }
 0x125   :  { %493 = vrcp.f32 %v355_v57  ;;  %v210_v62 = vadd.f32 %v209_v58, %v208_v55 }
 0x126   :  { %v223_v7 = vrot.slane %v222_v3, 1  ;;  %v369_v12 = vadd.f32 %v368_v6, %v367_v2 }
 0x127   :  { %495 = vrcp.f32 %v210_v62 }
 0x128   :  { %v224_v14 = vadd.f32 %v223_v7, %v222_v3 }
 0x12e   :  { %v490_v8 = vpop.eup %489 }
 0x12f   :  { %v371_v15 = vmul.f32 %v490_v8, %v363_v11 }
 0x130   :  { %v492_v10 = vpop.eup %491 }
 0x131   :  { %v226_v17 = vmul.f32 %v492_v10, %v218_v9 }
 0x132   :  { %v494_v13 = vpop.eup %493 }
 0x133   :  { %v373_v16 = vmul.f32 %v494_v13, %v369_v12 }
 0x134   :  { %v496_v19 = vpop.eup %495 }
 0x135   :  { %v397_v20 = vsel %vm390_vm1, %v373_v16, %v371_v15  ;;  %v228_v21 = vmul.f32 %v496_v19, %v224_v14 }
 0x136   :  { %399 = vst.msk [vmem:[#allocation9] sm:$0x3] %vm393_vm2, %v397_v20 }
 0x137   :  { %568 = shalt.err (!%p565_p5)
}
 0x138   :  { %419 = dma.vmem_to_hbm [thread:$0]  %s417_s16, 32, %s719_s5, [#allocation10]   ;;  %v391_v22 = vsel %vm390_vm1, %v228_v21, %v226_v17 }
 0x139   :  { %394 = vst.msk [vmem:[#allocation8] sm:$0x3] %vm393_vm2, %v391_v22  ;;  %s577_s22 = scalar_lea.vmem %s407_s18, 32  ;;  %p582_p7 = scmp.lt.s32.totalorder %s407_s18, %s407_s18 }
 0x13a   :  { %p578_p6 = scmp.ne.s32.totalorder %s407_s18, %s577_s22  ;;  %p583_p8 = scmp.lt.s32.totalorder %s577_s22, %s577_s22 }
 0x13c   :  { %p584_p9 = por %p583_p8, %p582_p7 }
 0x13e   :  { %p585_p10 = pnand %p584_p9, %p578_p6 }
 0x140   :  { %588 = shalt.err (!%p585_p10)
}
 0x141   :  { %409 = dma.vmem_to_hbm [thread:$0]  %s407_s18, 32, %s718_s4, [#allocation4]   ;;  %vm382_vm3 = vcmask 285696   ;;  %vm385_vm4 = vcmask 572416  }
 0x142   :  { %s636_s5 = smov [#allocation11]  }
 0x143   :  { %s425_s25 = sshll.u32 %s636_s5, 4  ;;  %s426_s25 = int_to_ptr.vmem [resolvable:$true] %s425_s25 }
 0x144   :  { %s597_s28 = scalar_lea.vmem %s426_s25, 256  ;;  %p602_p12 = scmp.lt.s32.totalorder %s426_s25, %s426_s25 }
 0x145   :  { %p598_p11 = scmp.ne.s32.totalorder %s426_s25, %s597_s28  ;;  %p603_p13 = scmp.lt.s32.totalorder %s597_s28, %s597_s28 }
 0x147   :  { %p604_p0 = por %p603_p13, %p602_p12 }
 0x149   :  { %p605_p1 = pnand %p604_p0, %p598_p11 }
 0x186   :  { %v377_v23 = vpop.permute.xlu0 %376 }
 0x187   :  { %v383_v24 = vsel %vm382_vm3, %v690_v18, %v377_v23 }
 0x188   :  { %386 = vst.msk [vmem:[#allocation11] sm:$0xff] %vm385_vm4, %v383_v24 }
 0x18a   :  { %v379_v25 = vpop.permute.xlu0 %378 }
 0x18b   :  { %v384_v27 = vsel %vm382_vm3, %v693_v26, %v379_v25 }
 0x18c   :  { %387 = vst.msk [vmem:[#allocation11 + $0x8] sm:$0xff] %vm385_vm4, %v384_v27 }
 0x18d   :  { %608 = shalt.err (!%p605_p1)
}
 0x18e   :  { %431 = dma.vmem_to_hbm [thread:$0]  %s426_s25, 256, %s720_s6, [#allocation10], %s627_s26, %s627_s26, %s628_s27  }
 0x18f   :  { %621 = dma.done.wait [#allocation4], 32  }
 0x190   :  { %622 = vsyncadd [#allocation4], 4294967264 }
 0x191   :  { %623 = dma.done.wait [#allocation10], 288  }
 0x192   :  { %624 = vsyncadd [#allocation10], 4294967008 }
 0x193   :  { %441 = vsyncpa [#allocation3], 1 }
 0x194   :  { %442 = vsyncpa [#allocation6], 1 }
 0x195   :  { %443 = vsyncpa [#allocation4], 1 }
 0x196   :  { %444 = vsyncpa [#allocation10], 1 }

</bundles_post_ra>
